<compile_context>
chip_gen: v5e
topology: v5e:2x2
jax: 0.10.0
libtpu: 0.0.40
codegen_flags: <defaults>
</compile_context>

<pallas_src>
import functools

import jax
import jax.numpy as jnp
from jax import lax
from jax.experimental import pallas as pl
from jax.experimental.pallas import tpu as pltpu

EPSILON = -10000000000.0   # kept for documentation of the PyTorch module
_NEG_BIG = -1e30           # excludes lane-padding columns from the softmax


def _round_up(x, m):
    return ((x + m - 1) // m) * m


def _attention_kernel(t_enc_true, t_enc_pad, t_dec_tile,
                      hl_ref, yl_ref, h_ref, y_ref, we_ref, wd_ref,
                      out_ref, enc_scratch):
    t = pl.program_id(1)

    Bb, Te, De = h_ref.shape      # Te = encoder time padded to a multiple of 128
    _, Tdt, Dd = y_ref.shape      # Tdt = decoder-time tile (multiple of 8)

    # ---- encoder projection: one (Bb*Te, De) x (De, Dd) matmul, cached across t ----
    @pl.when(t == 0)
    def _():
        h2 = h_ref[...].reshape(Bb * Te, De)
        enc = jnp.dot(h2, we_ref[...], preferred_element_type=jnp.float32)
        enc_scratch[...] = enc.reshape(Bb, Te, Dd).astype(enc_scratch.dtype)

    # ---- decoder projection for this T_dec tile ----
    y2 = y_ref[...].reshape(Bb * Tdt, Dd)
    dec = jnp.dot(y2, wd_ref[...], preferred_element_type=jnp.float32)
    dec = dec.reshape(Bb, Tdt, Dd).astype(enc_scratch.dtype)   # bf16 feed by default

    # ---- scores: batched (Bb,Tdt,Dd) . (Bb,Te,Dd)^T -> (Bb,Tdt,Te), f32 accum ----
    scores = lax.dot_general(dec, enc_scratch[...],
                             (((2,), (2,)), ((0,), (0,))),
                             preferred_element_type=jnp.float32)

    # ---- length mask (PyTorch semantics: masked logits become 0, not -inf) ----
    # Small iotas + one full-tile AND + one full-tile select (VPU-slot friendly).
    hl = hl_ref[...]   # (Bb, 1, 1) int32
    yl = yl_ref[...]   # (Bb, 1, 1) int32
    row = lax.broadcasted_iota(jnp.int32, (Bb, Tdt, 1), 1) + t * t_dec_tile
    col = lax.broadcasted_iota(jnp.int32, (Bb, 1, Te), 2)
    valid = (row < yl) & (col < hl)                    # (Bb, Tdt, Te)
    logits = jnp.where(valid, scores, 0.0)

    # Columns >= true T_enc exist only because of lane padding: exclude them from
    # the softmax entirely.  Static guard: emitted only when padding exists.
    if t_enc_pad != t_enc_true:
        logits = jnp.where(col < t_enc_true, logits, _NEG_BIG)

    # Note: the module's uniform "+ EPSILON" is omitted (softmax shift invariance).
    m = jnp.max(logits, axis=-1, keepdims=True)
    e = jnp.exp(logits - m)
    denom = jnp.sum(e, axis=-1, keepdims=True)
    out_ref[...] = (e * pl.reciprocal(denom, approx=True)).astype(out_ref.dtype)


def attention_pallas(h, h_len, y, y_len, w_enc, w_dec, *,
                     batch_block=None, t_dec_tile=None,
                     mxu_dtype=jnp.bfloat16, out_dtype=jnp.float32,
                     vmem_budget_bytes=None, interpret=False):
    """softmax( (y @ W_dec^T) @ (h @ W_enc^T)^T * length_mask )  -> (B, T_dec, T_enc)."""
    B, T_enc, D_enc = h.shape
    B2, T_dec, D_dec = y.shape
    assert B2 == B
    assert w_enc.shape == (D_dec, D_enc)
    assert w_dec.shape == (D_dec, D_dec)

    compute_dtype = jnp.dtype(mxu_dtype if mxu_dtype is not None else h.dtype)
    cb = compute_dtype.itemsize
    ob = jnp.dtype(out_dtype).itemsize

    # Lane-dense output + 128-wide N for the score matmul.
    T_enc_p = _round_up(T_enc, 128)

    # VMEM budget: default 48 MiB => fits v7x's 64 MiB with pipeline headroom,
    # and is comfortably inside v5e/v6e's 128 MiB.
    if vmem_budget_bytes is None:
        vmem_budget_bytes = 48 * 1024 * 1024

    def _resident_bytes(bb, tdt):
        return (
            2 * bb * T_enc_p * D_enc * cb            # h block (double-buffered)
            + 2 * bb * tdt * D_dec * cb              # y block (double-buffered)
            + 2 * (D_enc + D_dec) * D_dec * cb       # weights (double-buffered, constant)
            + 2 * bb * tdt * T_enc_p * ob            # output block (double-buffered)
            + bb * T_enc_p * D_dec * cb              # enc_scratch (persistent)
            + 4 * 8 * 128 * 4                        # padded length tiles
            + 2 * bb * tdt * T_enc_p * 4             # in-kernel f32 temporaries
        )

    # Decoder-time tile: sublane aligned, capped at 256 (v7x-safe), then shrunk
    # until a single-batch-element step fits the budget.
    if t_dec_tile is None:
        t_dec_tile = min(_round_up(T_dec, 8), 256)
    t_dec_tile = max(8, _round_up(t_dec_tile, 8))
    while t_dec_tile > 8 and _resident_bytes(1, t_dec_tile) > vmem_budget_bytes:
        t_dec_tile = max(8, _round_up(t_dec_tile // 2, 8))
    T_dec_p = _round_up(T_dec, t_dec_tile)

    # Batch block: largest value that fits the VMEM budget, capped at ceil(B/2) so
    # the "parallel" batch axis has >= 2 grid steps (both v7x TensorCores get work).
    if batch_block is None:
        bb_cap = B if B < 2 else -(-B // 2)
        Bb = 1
        for cand in range(min(bb_cap, B), 0, -1):
            if _resident_bytes(cand, t_dec_tile) <= vmem_budget_bytes:
                Bb = cand
                break
    else:
        Bb = max(1, min(batch_block, B))
    B_pad = _round_up(B, Bb)

    resident = _resident_bytes(Bb, t_dec_tile)
    vmem_limit = int(min(max(resident * 1.25 + (2 << 20), 16 << 20), 128 << 20))

    # ---- wrapper-side layout prep ----
    h_p = jnp.pad(h, ((0, B_pad - B), (0, T_enc_p - T_enc), (0, 0))).astype(compute_dtype)
    y_p = jnp.pad(y, ((0, B_pad - B), (0, T_dec_p - T_dec), (0, 0))).astype(compute_dtype)
    hl3 = jnp.pad(h_len.astype(jnp.int32), (0, B_pad - B)).reshape(B_pad, 1, 1)
    yl3 = jnp.pad(y_len.astype(jnp.int32), (0, B_pad - B)).reshape(B_pad, 1, 1)
    w_enc_t = jnp.transpose(w_enc).astype(compute_dtype)   # (D_enc, D_dec)
    w_dec_t = jnp.transpose(w_dec).astype(compute_dtype)   # (D_dec, D_dec)

    nb = B_pad // Bb
    nt = T_dec_p // t_dec_tile

    kernel = functools.partial(_attention_kernel, T_enc, T_enc_p, t_dec_tile)

    out_padded = pl.pallas_call(
        kernel,
        out_shape=jax.ShapeDtypeStruct((B_pad, T_dec_p, T_enc_p), out_dtype),
        grid=(nb, nt),
        in_specs=[
            pl.BlockSpec((Bb, 1, 1), lambda b, t: (b, 0, 0)),               # h_len
            pl.BlockSpec((Bb, 1, 1), lambda b, t: (b, 0, 0)),               # y_len
            pl.BlockSpec((Bb, T_enc_p, D_enc), lambda b, t: (b, 0, 0)),     # h
            pl.BlockSpec((Bb, t_dec_tile, D_dec), lambda b, t: (b, t, 0)),  # y
            pl.BlockSpec((D_enc, D_dec), lambda b, t: (0, 0)),              # W_enc^T
            pl.BlockSpec((D_dec, D_dec), lambda b, t: (0, 0)),              # W_dec^T
        ],
        out_specs=pl.BlockSpec((Bb, t_dec_tile, T_enc_p), lambda b, t: (b, t, 0)),
        scratch_shapes=[pltpu.VMEM((Bb, T_enc_p, D_dec), compute_dtype)],
        compiler_params=pltpu.CompilerParams(
            # batch axis independent; the T_dec axis carries the cached encoder
            # projection in scratch, so it must stay sequential.
            dimension_semantics=("parallel", "arbitrary"),
            vmem_limit_bytes=vmem_limit),
        interpret=interpret,
    )(hl3, yl3, h_p, y_p, w_enc_t, w_dec_t)

    # Strip batch / decoder-time / encoder-time padding.
    return out_padded[:B, :T_dec, :T_enc]


def attention_reference(h, h_len, y, y_len, w_enc, w_dec):
    """Pure-JAX mirror of the PyTorch forward.

    The module computes softmax(attn * mask + EPSILON); softmax is shift-invariant
    so the uniform EPSILON add is dropped here (it is only an f32 precision hazard).
    Masked logits stay at 0 (not -inf), exactly as in the module.
    """
    hi = lax.Precision.HIGHEST
    B, T_enc, _ = h.shape
    _, T_dec, _ = y.shape
    x_mask = (jnp.arange(T_enc)[None, :] < h_len[:, None]).astype(jnp.float32)
    y_mask = (jnp.arange(T_dec)[None, :] < y_len[:, None]).astype(jnp.float32)
    mask = y_mask[:, :, None] * x_mask[:, None, :]                   # (B, T_dec, T_enc)
    enc = jnp.einsum('bed,od->beo', h, w_enc, precision=hi)          # (B, T_enc, D_dec)
    dec = jnp.einsum('btd,od->bto', y, w_dec, precision=hi)          # (B, T_dec, D_dec)
    attn = jnp.einsum('bto,beo->bte', dec, enc, precision=hi)        # (B, T_dec, T_enc)
    attn = attn * mask
    return jax.nn.softmax(attn, axis=-1)


if __name__ == "__main__":
    # Small shapes consistent with the module.
    B, T_enc, T_dec = 2, 16, 8
    D_enc, D_dec = 32, 32

    key = jax.random.PRNGKey(0)
    k_h, k_y, k_we, k_wd = jax.random.split(key, 4)

    h = jax.random.normal(k_h, (B, T_enc, D_enc), dtype=jnp.float32)
    y = jax.random.normal(k_y, (B, T_dec, D_dec), dtype=jnp.float32)
    # lengths: max length equals the padded time dim (as create_mask assumes)
    h_len = jnp.array([T_enc, 10], dtype=jnp.int32)
    y_len = jnp.array([T_dec, 5], dtype=jnp.int32)

    # Deterministic xavier-normal-style init: std = sqrt(2 / (fan_in + fan_out))
    std_enc = (2.0 / (D_enc + D_dec)) ** 0.5
    std_dec = (2.0 / (D_dec + D_dec)) ** 0.5
    w_enc = std_enc * jax.random.normal(k_we, (D_dec, D_enc), dtype=jnp.float32)
    w_dec = std_dec * jax.random.normal(k_wd, (D_dec, D_dec), dtype=jnp.float32)

    ref = attention_reference(h, h_len, y, y_len, w_enc, w_dec)

    # 1) f32 MXU path: tight-ish check (reciprocal(approx) + MXU precision only).
    out_f32 = attention_pallas(h, h_len, y, y_len, w_enc, w_dec,
                               mxu_dtype=jnp.float32)
    out_f32 = jax.block_until_ready(out_f32)
    assert out_f32.shape == (B, T_dec, T_enc)
    assert jnp.allclose(out_f32, ref, atol=2e-2, rtol=2e-2), "f32 mismatch vs reference"

    # 2) default bf16 MXU path (production default): looser check.
    out_bf16 = attention_pallas(h, h_len, y, y_len, w_enc, w_dec)
    out_bf16 = jax.block_until_ready(out_bf16)
    assert out_bf16.shape == (B, T_dec, T_enc)
    assert jnp.allclose(out_bf16, ref, atol=5e-2, rtol=1e-1), "bf16 mismatch vs reference"

    print("KERNEL_OK")
</pallas_src>

<mosaic_0001>
module attributes {stable_mosaic.version = 11 : i64} {
  func.func @_attention_kernel(%arg0: i32, %arg1: i32, %arg2: memref<1x1x1xi32, #tpu.memory_space<vmem>>, %arg3: memref<1x1x1xi32, #tpu.memory_space<vmem>>, %arg4: memref<1x128x32xf32, #tpu.memory_space<vmem>>, %arg5: memref<1x8x32xf32, #tpu.memory_space<vmem>>, %arg6: memref<32x32xf32, #tpu.memory_space<vmem>>, %arg7: memref<32x32xf32, #tpu.memory_space<vmem>>, %arg8: memref<1x8x128xf32, #tpu.memory_space<vmem>>, %arg9: memref<1x128x32xf32, #tpu.memory_space<vmem>>) attributes {dimension_semantics = [#tpu.dimension_semantics<parallel>, #tpu.dimension_semantics<arbitrary>], iteration_bounds = array<i64: 2, 1>, scalar_prefetch = 0 : i64, scratch_operands = 1 : i64, tpu.core_type = #tpu.core_type<tc>, window_params = [{transform_indices = @transform_0, window_bounds = array<i64: 1, 1, 1>}, {transform_indices = @transform_1, window_bounds = array<i64: 1, 1, 1>}, {transform_indices = @transform_2, window_bounds = array<i64: 1, 128, 32>}, {transform_indices = @transform_3, window_bounds = array<i64: 1, 8, 32>}, {pipeline_mode = #tpu.pipeline_mode<synchronous>, transform_indices = @transform_4, window_bounds = array<i64: 32, 32>}, {pipeline_mode = #tpu.pipeline_mode<synchronous>, transform_indices = @transform_5, window_bounds = array<i64: 32, 32>}, {transform_indices = @transform_6, window_bounds = array<i64: 1, 8, 128>}]} {
    %c0_i32 = arith.constant 0 : i32
    %0 = arith.cmpi eq, %arg1, %c0_i32 : i32
    %1 = arith.extui %0 : i1 to i32
    %c0_i32_0 = arith.constant 0 : i32
    %2 = arith.cmpi ne, %1, %c0_i32_0 : i32
    scf.if %2 {
      %c0_22 = arith.constant 0 : index
      %c0_23 = arith.constant 0 : index
      %c0_24 = arith.constant 0 : index
      %43 = vector.load %arg4[%c0_22, %c0_23, %c0_24] : memref<1x128x32xf32, #tpu.memory_space<vmem>>, vector<1x128x32xf32>
      %44 = vector.shape_cast %43 : vector<1x128x32xf32> to vector<128x32xf32>
      %c0_25 = arith.constant 0 : index
      %c0_26 = arith.constant 0 : index
      %45 = vector.load %arg6[%c0_25, %c0_26] : memref<32x32xf32, #tpu.memory_space<vmem>>, vector<32x32xf32>
      %cst_27 = arith.constant dense<0.000000e+00> : vector<128x32xf32>
      %46 = tpu.matmul %44, %45, %cst_27 {dimension_numbers = #tpu.dot_dimension_numbers<[1], [0], [0], [1], [0, 0, 1, 1], [], []>} : vector<128x32xf32>, vector<32x32xf32>, vector<128x32xf32> -> vector<128x32xf32>
      %47 = vector.shape_cast %46 : vector<128x32xf32> to vector<1x128x32xf32>
      %c0_28 = arith.constant 0 : index
      %c0_29 = arith.constant 0 : index
      %c0_30 = arith.constant 0 : index
      %48 = vector.load %arg9[%c0_28, %c0_29, %c0_30] : memref<1x128x32xf32, #tpu.memory_space<vmem>>, vector<1x128x32xf32>
      tpu.vector_store %arg9[%c0_28, %c0_29, %c0_30], %47 {strides = array<i32>} : memref<1x128x32xf32, #tpu.memory_space<vmem>>, vector<1x128x32xf32>,
    } else {
    }
    %c0 = arith.constant 0 : index
    %c0_1 = arith.constant 0 : index
    %c0_2 = arith.constant 0 : index
    %3 = vector.load %arg5[%c0, %c0_1, %c0_2] : memref<1x8x32xf32, #tpu.memory_space<vmem>>, vector<1x8x32xf32>
    %4 = vector.shape_cast %3 : vector<1x8x32xf32> to vector<8x32xf32>
    %c0_3 = arith.constant 0 : index
    %c0_4 = arith.constant 0 : index
    %5 = vector.load %arg7[%c0_3, %c0_4] : memref<32x32xf32, #tpu.memory_space<vmem>>, vector<32x32xf32>
    %cst = arith.constant dense<0.000000e+00> : vector<8x32xf32>
    %6 = tpu.matmul %4, %5, %cst {dimension_numbers = #tpu.dot_dimension_numbers<[1], [0], [0], [1], [0, 0, 1, 1], [], []>} : vector<8x32xf32>, vector<32x32xf32>, vector<8x32xf32> -> vector<8x32xf32>
    %7 = vector.shape_cast %6 : vector<8x32xf32> to vector<1x8x32xf32>
    %c0_5 = arith.constant 0 : index
    %c0_6 = arith.constant 0 : index
    %c0_7 = arith.constant 0 : index
    %8 = vector.load %arg9[%c0_5, %c0_6, %c0_7] : memref<1x128x32xf32, #tpu.memory_space<vmem>>, vector<1x128x32xf32>
    %cst_8 = arith.constant dense<0.000000e+00> : vector<1x8x128xf32>
    %9 = tpu.matmul %7, %8, %cst_8 {dimension_numbers = #tpu.dot_dimension_numbers<[2], [2], [1], [1], [0, 0, 0, 1, 1, 1], [0], [0]>} : vector<1x8x32xf32>, vector<1x128x32xf32>, vector<1x8x128xf32> -> vector<1x8x128xf32>
    %c0_9 = arith.constant 0 : index
    %c0_10 = arith.constant 0 : index
    %c0_11 = arith.constant 0 : index
    %10 = vector.load %arg2[%c0_9, %c0_10, %c0_11] : memref<1x1x1xi32, #tpu.memory_space<vmem>>, vector<1x1x1xi32>
    %c0_12 = arith.constant 0 : index
    %c0_13 = arith.constant 0 : index
    %c0_14 = arith.constant 0 : index
    %11 = vector.load %arg3[%c0_12, %c0_13, %c0_14] : memref<1x1x1xi32, #tpu.memory_space<vmem>>, vector<1x1x1xi32>
    %12 = tpu.iota {dimensions = array<i32: 1>} : vector<1x8x1xi32>
    %c8_i32 = arith.constant 8 : i32
    %13 = arith.muli %arg1, %c8_i32 : i32
    %14 = vector.broadcast %13 : i32 to vector<1x8x1xi32>
    %15 = arith.addi %12, %14 : vector<1x8x1xi32>
    %16 = tpu.iota {dimensions = array<i32: 2>} : vector<1x1x128xi32>
    %17 = vector.broadcast %11 : vector<1x1x1xi32> to vector<1x8x1xi32>
    %18 = arith.cmpi slt, %15, %17 : vector<1x8x1xi32>
    %19 = vector.broadcast %10 : vector<1x1x1xi32> to vector<1x1x128xi32>
    %20 = arith.cmpi slt, %16, %19 : vector<1x1x128xi32>
    %21 = vector.broadcast %18 : vector<1x8x1xi1> to vector<1x8x128xi1>
    %22 = vector.broadcast %20 : vector<1x1x128xi1> to vector<1x8x128xi1>
    %23 = arith.andi %21, %22 : vector<1x8x128xi1>
    %cst_15 = arith.constant 0.000000e+00 : f32
    %24 = vector.broadcast %cst_15 : f32 to vector<1x8x128xf32>
    %25 = arith.select %23, %9, %24 : vector<1x8x128xi1>, vector<1x8x128xf32>
    %c16_i32 = arith.constant 16 : i32
    %26 = vector.broadcast %c16_i32 : i32 to vector<1x1x128xi32>
    %27 = arith.cmpi slt, %16, %26 : vector<1x1x128xi32>
    %cst_16 = arith.constant -1.000000e+30 : f32
    %28 = vector.shape_cast %27 : vector<1x1x128xi1> to vector<1x1x128xi1>
    %29 = vector.broadcast %28 : vector<1x1x128xi1> to vector<1x8x128xi1>
    %30 = vector.broadcast %cst_16 : f32 to vector<1x8x128xf32>
    %31 = arith.select %29, %25, %30 : vector<1x8x128xi1>, vector<1x8x128xf32>
    %cst_17 = arith.constant dense<0xFF800000> : vector<1x8xf32>
    %32 = vector.multi_reduction <maximumf>, %31, %cst_17 [2] : vector<1x8x128xf32> to vector<1x8xf32>
    %33 = vector.shape_cast %32 : vector<1x8xf32> to vector<1x8x1xf32>
    %34 = vector.broadcast %33 : vector<1x8x1xf32> to vector<1x8x128xf32>
    %35 = arith.subf %31, %34 : vector<1x8x128xf32>
    %36 = math.exp %35 : vector<1x8x128xf32>
    %cst_18 = arith.constant dense<0.000000e+00> : vector<1x8xf32>
    %37 = vector.multi_reduction <add>, %36, %cst_18 [2] : vector<1x8x128xf32> to vector<1x8xf32>
    %38 = vector.shape_cast %37 : vector<1x8xf32> to vector<1x8x1xf32>
    %39 = tpu.reciprocal %38 {approx = true} : vector<1x8x1xf32> -> vector<1x8x1xf32>
    %40 = vector.broadcast %39 : vector<1x8x1xf32> to vector<1x8x128xf32>
    %41 = arith.mulf %36, %40 : vector<1x8x128xf32>
    %c0_19 = arith.constant 0 : index
    %c0_20 = arith.constant 0 : index
    %c0_21 = arith.constant 0 : index
    %42 = vector.load %arg8[%c0_19, %c0_20, %c0_21] : memref<1x8x128xf32, #tpu.memory_space<vmem>>, vector<1x8x128xf32>
    tpu.vector_store %arg8[%c0_19, %c0_20, %c0_21], %41 {strides = array<i32>} : memref<1x8x128xf32, #tpu.memory_space<vmem>>, vector<1x8x128xf32>,
    return
  }
  func.func @transform_0(%arg0: i32, %arg1: i32) -> (i32, i32, i32) {
    %c0_i32 = arith.constant 0 : i32
    %c0_i32_0 = arith.constant 0 : i32
    %c0_i32_1 = arith.constant 0 : i32
    return %arg0, %c0_i32, %c0_i32_0 : i32, i32, i32
  }
  func.func @transform_1(%arg0: i32, %arg1: i32) -> (i32, i32, i32) {
    %c0_i32 = arith.constant 0 : i32
    %c0_i32_0 = arith.constant 0 : i32
    %c0_i32_1 = arith.constant 0 : i32
    return %arg0, %c0_i32, %c0_i32_0 : i32, i32, i32
  }
  func.func @transform_2(%arg0: i32, %arg1: i32) -> (i32, i32, i32) {
    %c0_i32 = arith.constant 0 : i32
    %c0_i32_0 = arith.constant 0 : i32
    %c0_i32_1 = arith.constant 0 : i32
    return %arg0, %c0_i32, %c0_i32_0 : i32, i32, i32
  }
  func.func @transform_3(%arg0: i32, %arg1: i32) -> (i32, i32, i32) {
    %c0_i32 = arith.constant 0 : i32
    %c0_i32_0 = arith.constant 0 : i32
    return %arg0, %arg1, %c0_i32 : i32, i32, i32
  }
  func.func @transform_4(%arg0: i32, %arg1: i32) -> (i32, i32) {
    %c0_i32 = arith.constant 0 : i32
    %c0_i32_0 = arith.constant 0 : i32
    %c0_i32_1 = arith.constant 0 : i32
    return %c0_i32, %c0_i32_0 : i32, i32
  }
  func.func @transform_5(%arg0: i32, %arg1: i32) -> (i32, i32) {
    %c0_i32 = arith.constant 0 : i32
    %c0_i32_0 = arith.constant 0 : i32
    %c0_i32_1 = arith.constant 0 : i32
    return %c0_i32, %c0_i32_0 : i32, i32
  }
  func.func @transform_6(%arg0: i32, %arg1: i32) -> (i32, i32, i32) {
    %c0_i32 = arith.constant 0 : i32
    %c0_i32_0 = arith.constant 0 : i32
    return %arg0, %arg1, %c0_i32 : i32, i32, i32
  }
}

</mosaic_0001>

<bundles_post_ra>
// kernel: tpu_custom_call.1
= control target key start
LH: loop header
LB: loop body
LE: loop exit
PB: predicated region body
PF: predicated region fallthrough
CT: control target
= control target key end

     0   :  { %11 = vsyncpa [#allocation4], 0  ;;  %s1190_s0 = inlined_call_operand.vmem [shape: s32[2,1,1], index: 0, kind: input, shape index: {}]   ;;  %s1191_s1 = inlined_call_operand.vmem [shape: s32[2,1,1], index: 1, kind: input, shape index: {}]   ;;  %s1192_s2 = inlined_call_operand.vmem [shape: f32[2,128,32], index: 2, kind: input, shape index: {}]   ;;  %s1193_s3 = inlined_call_operand.vmem [shape: f32[2,8,32], index: 3, kind: input, shape index: {}]   ;;  %s1194_s4 = inlined_call_operand.vmem [shape: f32[32,32], index: 4, kind: input, shape index: {}]   ;;  %s1195_s5 = inlined_call_operand.vmem [shape: f32[32,32], index: 5, kind: input, shape index: {}]   ;;  %s1196_s6 = inlined_call_operand.hbm [shape: f32[2,8,128], index: 6, kind: output, shape index: {}]  }
   0x1   :  { %13 = vsyncpa [#allocation4 + $0x1], 0  ;;  %s981_s21 = smov 0   ;;  %s983_s22 = smov 0  }
   0x2   :  { %s985_s23 = smov 0   ;;  %s987_s24 = smov 0  }
   0x3   :  { %s989_s25 = smov 0   ;;  %s991_s26 = smov 0  }
   0x4 LB: > { %s747_s27 = sadd.s32 4294967295, %s943_s26   ;;  %s748_s28 = sadd.s32 4294967294, %s943_s26   ;;  %s943_s26 = sphi %s991_s26, %s19_s26   ;;  %s939_s25 = sphi %s989_s25, %s1203_s25   ;;  %s935_s24 = sphi %s987_s24, %s1202_s24   ;;  %s931_s23 = sphi %s985_s23, %s1201_s23   ;;  %s927_s22 = sphi %s983_s22, %s1200_s22   ;;  %s923_s21 = sphi %s981_s21, %s1199_s21  }
   0x5   : > { %s31_s29 = sadd.s32 1, %s939_s25  ;;  %s188_s30 = sadd.s32 1, %s931_s23 }
   0x6   : > { %p33_p0 = scmp.ge.s32.totalorder %s31_s29, 2  ;;  %p198_p1 = scmp.ne.s32.totalorder %s931_s23, %s927_s22 }
   0x7   : > { %p199_p2 = scmp.eq.s32.totalorder %s747_s27, 1  ;;  %p204_p3 = scmp.ne.s32.totalorder %s927_s22, %s923_s21 }
   0x8   : > { %s1205_s29 = smov (%p33_p0, %s31_s29), 0  ;;  %p205_p5 = scmp.eq.s32.totalorder %s748_s28, 1 }
   0x9   : > { %p1021_p4 = por %p199_p2, %p198_p1  ;;  %s183_s8 = ssub.s32 %s939_s25, %s1205_s29 }
   0xa   : > { %p751_p6 = scmp.ge.s32.totalorder %s943_s26, 1  ;;  %p186_p7 = scmp.eq.s32.totalorder %s183_s8, 0 }
   0xb   : > { %p1028_p8 = por %p205_p5, %p204_p3  ;;  %p259_p9 = scmp.lt.s32.totalorder %s943_s26, 3 }
   0xc   : > { %s1034_s10 = scalar_select %p186_p7, %s931_s23, %s188_s30  }
   0xd   : > { %p260_p10 = pnand %p751_p6, %p259_p9 }
   0xe   : > { %p302_p11 = scmp.lt.s32.totalorder (!%p260_p10), %s935_s24, 1  ;;  %s791_s19 = sshll.u32 (!%p260_p10), %s935_s24, 3 }
   0xf   : > { %263 = sbr.rel (%p260_p10) target bundleno = 668 (0x29c), region = 44  ;;  %s641_s28 = scalar_lea.hbm (!%p260_p10), %s1196_s6, %s791_s19 }
  0x10   : > { %s885_s16 = scalar_lea.hbm (!%p260_p10), %s1196_s6, 16 }
  0x14   : > { %v343_v0 = vld [vmem:[%s1194_s4 + $0x18] sm:$0xff]  ;;  %v342_v1 = vld [vmem:[%s1194_s4 + $0x10] sm:$0xff]  ;;  %v341_v2 = vld [vmem:[%s1194_s4 + $0x8] sm:$0xff]  ;;  %s1047_s17 = scalar_select %p302_p11, %s935_s24, 1  ;;  %vm344_vm0 = vcmask 261120   ;;  %v592_v49 = vlaneseq  ;;  %v945_v52 = vmov 0  }
  0x15   : > { %796 = vmatpush.msra.mxu3 %v343_v0  ;;  %405 = vmatpush.msra.mxu0 %v343_v0  ;;  %v340_v3 = vld [vmem:[%s1194_s4] sm:$0xff]  ;;  %v478_v13 = vld [vmem:[%s1195_s5 + $0x18] sm:$0xff]  ;;  %v477_v14 = vld [vmem:[%s1195_s5 + $0x10] sm:$0xff] }
  0x16   : > { %795 = vmatpush.msra.mxu1 %v343_v0  ;;  %s794_s20 = sshll.u32 %s1047_s17, 7  ;;  %s755_s12 = sshll.u32 %s1047_s17, 3  ;;  %v476_v15 = vld [vmem:[%s1195_s5 + $0x8] sm:$0xff]  ;;  %v475_v18 = vld [vmem:[%s1195_s5] sm:$0xff]  ;;  %859 = vset.pattern.permute.xlu0 %v945_v52  ;;  %v593_v53 = vshrl.u32 %v592_v49, 7 }
  0x17   : > { %798 = vmatpush.msra.mxu3 %v342_v1  ;;  %406 = vmatpush.msra.mxu0 %v342_v1  ;;  %s1056_s30 = scalar_lea.vmem %s1192_s2, %s794_s20  ;;  %s319_s20 = scalar_lea.vmem %s1193_s3, %s755_s12 }
  0x18   : > { %797 = vmatpush.msra.mxu1 %v342_v1  ;;  %v333_v4 = vld [vmem:[%s1056_s30 + $0x48] sm:$0xff]  ;;  %v334_v5 = vld [vmem:[%s1056_s30 + $0x50] sm:$0xff]  ;;  %v324_v6 = vld [vmem:[%s1056_s30] sm:$0xff]  ;;  %s307_s12 = scalar_lea.vmem %s1191_s1, %s1047_s17  ;;  %s304_s14 = scalar_lea.vmem %s1190_s0, %s1047_s17 }
  0x19   : > { %800 = vmatpush.msra.mxu3 %v341_v2  ;;  %407 = vmatpush.msra.mxu0 %v341_v2  ;;  %v335_v7 = vld [vmem:[%s1056_s30 + $0x58] sm:$0xff]  ;;  %v325_v8 = vld [vmem:[%s1056_s30 + $0x8] sm:$0xff]  ;;  %v336_v10 = vld [vmem:[%s1056_s30 + $0x60] sm:$0xff]  ;;  %s299_s17 = sand.u32 1, %s927_s22  }
  0x1a   : > { %799 = vmatpush.msra.mxu1 %v341_v2  ;;  %v331_v9 = vld [vmem:[%s1056_s30 + $0x38] sm:$0xff]  ;;  %v326_v11 = vld [vmem:[%s1056_s30 + $0x10] sm:$0xff]  ;;  %v332_v12 = vld [vmem:[%s1056_s30 + $0x40] sm:$0xff]  ;;  %v598_v2 = vand.u32 127, %v592_v49  ;;  %s752_s18 = sshll.u32 %s299_s17, 3 }
  0x1b   : > { %802 = vmatpush.msra.mxu3 %v340_v3  ;;  %408 = vmatpush.msra.mxu0 %v340_v3  ;;  %v337_v16 = vld [vmem:[%s1056_s30 + $0x68] sm:$0xff]  ;;  %v327_v17 = vld [vmem:[%s1056_s30 + $0x18] sm:$0xff]  ;;  %v474_v19 = vld [vmem:[%s319_s20] sm:$0xff]  ;;  %s301_s8 = scalar_lea.vmem [#allocation3], %s752_s18 }
  0x1c   : > { %765 = vmatmul.msk.f32.vlgmr.msra.gmra.mxu3 %vm344_vm0, %v333_v4  ;;  %801 = vmatpush.msra.mxu1 %v340_v3  ;;  %v338_v20 = vld [vmem:[%s1056_s30 + $0x70] sm:$0xff]  ;;  %v328_v21 = vld [vmem:[%s1056_s30 + $0x20] sm:$0xff]  ;;  %v339_v22 = vld [vmem:[%s1056_s30 + $0x78] sm:$0xff]  ;;  %vm615_vm4 = vcmp.lt.s32.totalorder %v598_v2, 16  ;;  %s643_s11 = sshll.u32 %s301_s8, 4  ;;  %s644_s11 = int_to_ptr.vmem [resolvable:$true] %s643_s11 }
  0x1d   : > { %756 = vmatmul.msk.f32.vlgmr.msra.gmra.mxu0 %vm344_vm0, %v324_v6  ;;  %763 = vmatmul.msk.f32.vlgmr.msra.gmra.mxu1 %vm344_vm0, %v331_v9  ;;  %v329_v23 = vld [vmem:[%s1056_s30 + $0x28] sm:$0xff]  ;;  %v330_v24 = vld [vmem:[%s1056_s30 + $0x30] sm:$0xff]  ;;  %v860_v50 = vld [vmem:[%s307_s12] ss:$0 sm:$0xff]  ;;  %s645_s12 = sshll.u32 %s641_s28, 4  ;;  %s630_s30 = scalar_lea.sflag [#allocation4], %s299_s17  ;;  %s646_s12 = int_to_ptr.hbm [resolvable:$true] %s645_s12 }
  0x1e   : > { %495 = vmatpush.msrb.mxu1 %v478_v13  ;;  %v590_v51 = vld [vmem:[%s304_s14] sm:$0x1]  ;;  %vm600_vm1 = vcmp.lt.s32.totalorder %v593_v53, %v860_v50  ;;  %s879_s13 = sshra.s32 %s646_s12, 4  ;;  %s880_s13 = int_to_ptr.hbm [resolvable:$true] %s879_s13 }
  0x1f   : > { %602 = vperm.xlu0 %859, %v590_v51   ;;  %v606_v56 = vsel %vm600_vm1, 1, %v945_v52  ;;  %s881_s14 = scalar_lea.hbm %s880_s13, 8  ;;  %p886_p1 = scmp.lt.s32.totalorder %s880_s13, %s1196_s6 }
  0x20   : > { %496 = vmatpush.msrb.mxu1 %v477_v14  ;;  %p882_p12 = scmp.ne.s32.totalorder %s880_s13, %s881_s14  ;;  %p887_p2 = scmp.lt.s32.totalorder %s885_s16, %s881_s14 }
  0x22   : > { %497 = vmatpush.msrb.mxu1 %v476_v15  ;;  %p883_p13 = pnand %p882_p12, %p1021_p4  ;;  %p888_p3 = por %p887_p2, %p886_p1 }
  0x24   : > { %766 = vmatmul.msk.f32.gmra.mxu3 %vm344_vm0, %v334_v5  ;;  %498 = vmatpush.msrb.mxu1 %v475_v18  ;;  %p884_p0 = pneg %p883_p13 }
  0x25   : > { %757 = vmatmul.msk.f32.gmra.mxu0 %vm344_vm0, %v325_v8  ;;  %764 = vmatmul.msk.f32.gmra.mxu1 %vm344_vm0, %v332_v12 }
  0x26   : > { %p889_p5 = pnand %p888_p3, %p884_p0 }
  0x27   : > { %608 = vperm.xlu0 %859, %v606_v56  }
  0x2c   : > { %767 = vmatmul.msk.f32.gmra.mxu3 %vm344_vm0, %v335_v7 }
  0x2d   : > { %758 = vmatmul.msk.f32.gmra.mxu0 %vm344_vm0, %v326_v11  ;;  %772 = vmatmul.msk.f32.vlgmr.msrb.gmra.mxu1 %vm344_vm0, %v474_v19 }
  0x34   : > { %768 = vmatmul.msk.f32.gmra.mxu3 %vm344_vm0, %v336_v10 }
  0x35   : > { %759 = vmatmul.msk.f32.gmra.mxu0 %vm344_vm0, %v327_v17 }
  0x3c   : > { %769 = vmatmul.msk.f32.gmra.mxu3 %vm344_vm0, %v337_v16 }
  0x3d   : > { %760 = vmatmul.msk.f32.gmra.mxu0 %vm344_vm0, %v328_v21 }
  0x44   : > { %770 = vmatmul.msk.f32.gmra.mxu3 %vm344_vm0, %v338_v20 }
  0x45   : > { %761 = vmatmul.msk.f32.gmra.mxu0 %vm344_vm0, %v329_v23 }
  0x4c   : > { %771 = vmatmul.msk.f32.gmra.mxu3 %vm344_vm0, %v339_v22 }
  0x4d   : > { %762 = vmatmul.msk.f32.gmra.mxu0 %vm344_vm0, %v330_v24 }
  0x91   : > { %v603_v0 = vpop.permute.xlu0 %602 }
  0x92   : > { %v604_v1 = vperm.slane %v603_v0, 0 }
  0x94   : > { %vm605_vm2 = vcmp.lt.s32.totalorder %v598_v2, %v604_v1 }
  0x99   : > { %v609_v3 = vpop.permute.xlu0 %608 }
  0x9a   : > { %v410_v26 = vpop.f32.mrf.mxu0  ;;  %v431_v34 = vpop.f32.mrf.mxu1  ;;  %vm610_vm3 = vcmp.eq.s32.totalorder %v609_v3, 1 }
  0x9b   : > { %458 = vst.msk [vmem:[#allocation2] sm:$0xff] %vm344_vm0, %v410_v26  ;;  %vm613_vm5 = vmand %vm610_vm3, %vm605_vm2 }
  0x9c   : > { %465 = vst.msk [vmem:[#allocation2 + $0x38] sm:$0xff] %vm344_vm0, %v431_v34 }
  0x9f   : > { %v437_v25 = vpop.f32.mrf.mxu3 }
  0xa0   : > { %467 = vst.msk [vmem:[#allocation2 + $0x48] sm:$0xff] %vm344_vm0, %v437_v25 }
  0xa2   : > { %v413_v28 = vpop.f32.mrf.mxu0  ;;  %v434_v37 = vpop.f32.mrf.mxu1  ;;  %v503_v62 = vld [vmem:[#allocation2] sm:$0xff] }
  0xa3   : > { %459 = vst.msk [vmem:[#allocation2 + $0x8] sm:$0xff] %vm344_vm0, %v413_v28  ;;  %v510_v54 = vld [vmem:[#allocation2 + $0x38] sm:$0xff] }
  0xa4   : > { %466 = vst.msk [vmem:[#allocation2 + $0x40] sm:$0xff] %vm344_vm0, %v434_v37 }
  0xa7   : > { %v440_v27 = vpop.f32.mrf.mxu3  ;;  %v512_v47 = vld [vmem:[#allocation2 + $0x48] sm:$0xff] }
  0xa8   : > { %468 = vst.msk [vmem:[#allocation2 + $0x50] sm:$0xff] %vm344_vm0, %v440_v27 }
  0xaa   : > { %v416_v30 = vpop.f32.mrf.mxu0  ;;  %v504_v61 = vld [vmem:[#allocation2 + $0x8] sm:$0xff]  ;;  %v500_v63 = vpop.f32.mrf.mxu1 }
  0xab   : > { %460 = vst.msk [vmem:[#allocation2 + $0x10] sm:$0xff] %vm344_vm0, %v416_v30  ;;  %v511_v48 = vld [vmem:[#allocation2 + $0x40] sm:$0xff] }
  0xaf   : > { %v443_v29 = vpop.f32.mrf.mxu3  ;;  %v513_v46 = vld [vmem:[#allocation2 + $0x50] sm:$0xff] }
  0xb0   : > { %469 = vst.msk [vmem:[#allocation2 + $0x58] sm:$0xff] %vm344_vm0, %v443_v29 }
  0xb2   : > { %v419_v32 = vpop.f32.mrf.mxu0  ;;  %v505_v60 = vld [vmem:[#allocation2 + $0x10] sm:$0xff] }
  0xb3   : > { %461 = vst.msk [vmem:[#allocation2 + $0x18] sm:$0xff] %vm344_vm0, %v419_v32 }
  0xb7   : > { %v446_v31 = vpop.f32.mrf.mxu3  ;;  %v514_v45 = vld [vmem:[#allocation2 + $0x58] sm:$0xff] }
  0xb8   : > { %470 = vst.msk [vmem:[#allocation2 + $0x60] sm:$0xff] %vm344_vm0, %v446_v31 }
  0xba   : > { %v422_v35 = vpop.f32.mrf.mxu0  ;;  %v506_v59 = vld [vmem:[#allocation2 + $0x18] sm:$0xff] }
  0xbb   : > { %462 = vst.msk [vmem:[#allocation2 + $0x20] sm:$0xff] %vm344_vm0, %v422_v35 }
  0xbf   : > { %v449_v33 = vpop.f32.mrf.mxu3  ;;  %v515_v44 = vld [vmem:[#allocation2 + $0x60] sm:$0xff] }
  0xc0   : > { %471 = vst.msk [vmem:[#allocation2 + $0x68] sm:$0xff] %vm344_vm0, %v449_v33 }
  0xc2   : > { %v425_v38 = vpop.f32.mrf.mxu0  ;;  %v507_v58 = vld [vmem:[#allocation2 + $0x20] sm:$0xff] }
  0xc3   : > { %463 = vst.msk [vmem:[#allocation2 + $0x28] sm:$0xff] %vm344_vm0, %v425_v38 }
  0xc7   : > { %v452_v36 = vpop.f32.mrf.mxu3  ;;  %v516_v43 = vld [vmem:[#allocation2 + $0x68] sm:$0xff] }
  0xc8   : > { %472 = vst.msk [vmem:[#allocation2 + $0x70] sm:$0xff] %vm344_vm0, %v452_v36 }
  0xca   : > { %v428_v40 = vpop.f32.mrf.mxu0  ;;  %v508_v57 = vld [vmem:[#allocation2 + $0x28] sm:$0xff] }
  0xcb   : > { %464 = vst.msk [vmem:[#allocation2 + $0x30] sm:$0xff] %vm344_vm0, %v428_v40 }
  0xcf   : > { %v455_v39 = vpop.f32.mrf.mxu3  ;;  %v517_v42 = vld [vmem:[#allocation2 + $0x70] sm:$0xff] }
  0xd0   : > { %473 = vst.msk [vmem:[#allocation2 + $0x78] sm:$0xff] %vm344_vm0, %v455_v39 }
  0xd2   : > { %v509_v55 = vld [vmem:[#allocation2 + $0x30] sm:$0xff] }
  0xd7   : > { %v518_v41 = vld [vmem:[#allocation2 + $0x78] sm:$0xff] }
  0xd8   : > { %773 = vmatpush.xpose.msk.msra.mxu2 %vm344_vm0, %v518_v41 }
  0xdc   : > { %774 = vmatpush.xpose.msk.msra.mxu2 %vm344_vm0, %v517_v42 }
  0xe0   : > { %775 = vmatpush.xpose.msk.msra.mxu2 %vm344_vm0, %v516_v43 }
  0xe4   : > { %776 = vmatpush.xpose.msk.msra.mxu2 %vm344_vm0, %v515_v44 }
  0xe8   : > { %777 = vmatpush.xpose.msk.msra.mxu2 %vm344_vm0, %v514_v45 }
  0xec   : > { %778 = vmatpush.xpose.msk.msra.mxu2 %vm344_vm0, %v513_v46 }
  0xf0   : > { %779 = vmatpush.xpose.msk.msra.mxu2 %vm344_vm0, %v512_v47 }
  0xf4   : > { %780 = vmatpush.xpose.msk.msra.mxu2 %vm344_vm0, %v511_v48 }
  0xf8   : > { %781 = vmatpush.xpose.msk.msra.mxu2 %vm344_vm0, %v510_v54 }
  0xfc   : > { %782 = vmatpush.xpose.msk.msra.mxu2 %vm344_vm0, %v509_v55 }
 0x100   : > { %783 = vmatpush.xpose.msk.msra.mxu2 %vm344_vm0, %v508_v57 }
 0x104   : > { %784 = vmatpush.xpose.msk.msra.mxu2 %vm344_vm0, %v507_v58 }
 0x108   : > { %785 = vmatpush.xpose.msk.msra.mxu2 %vm344_vm0, %v506_v59 }
 0x10c   : > { %786 = vmatpush.xpose.msk.msra.mxu2 %vm344_vm0, %v505_v60 }
 0x110   : > { %787 = vmatpush.xpose.msk.msra.mxu2 %vm344_vm0, %v504_v61 }
 0x114   : > { %788 = vmatpush.xpose.msk.msra.mxu2 %vm344_vm0, %v503_v62 }
 0x117   : > { %789 = vmatmul.msk.f32.vlgmr.msra.gmra.mxu2 %vm344_vm0, %v500_v63 }
 0x19a   : > { %v587_v4 = vpop.f32.mrf.mxu2 }
 0x19b   : > { %v614_v5 = vsel %vm613_vm5, %v587_v4, 0.0 }
 0x19c   : > { %v618_v6 = vsel %vm615_vm4, %v614_v5, -1e+30 }
 0x19d   : > { %619 = vmax.xlane.f32.xlu1 %v618_v6 }
 0x210   : > { %v620_v7 = vpop.xlane.xlu1 %619 }
 0x211   : > { %v621_v8 = vsub.f32 %v618_v6, %v620_v7 }
 0x213   : > { %v622_v9 = vmul.f32 1.442695, %v621_v8 }
 0x215   : > { %861 = vpow2.f32 %v622_v9 }
 0x21b   : > { %v862_v10 = vpop.eup %861 }
 0x21c   : > { %624 = vadd.xlane.f32.xlu1 %v862_v10 }
 0x28f   : > { %v625_v11 = vpop.xlane.xlu1 %624 }
 0x290   : > { %863 = vrcp.f32 %v625_v11 }
 0x296   : > { %v864_v12 = vpop.eup %863 }
 0x297   : > { %v627_v13 = vmul.f32 %v864_v12, %v862_v10 }
 0x299   : > { %628 = vst [vmem:[%s301_s8] sm:$0xff] %v627_v13 }
 0x29a   : > { %892 = shalt.err (!%p889_p5)
}
 0x29b   : > { %803 = dma.vmem_to_hbm [thread:$0]  (%p1021_p4), %s644_s11, 128, %s646_s12, %s630_s30  }
 0x29c PF: > { %p809_p6 = scmp.ge.s32.totalorder %s943_s26, 2  ;;  %s657_s17 = sand.u32 1, %s923_s21  }
 0x29d   : > { %s658_s20 = scalar_lea.sflag [#allocation4], %s657_s17 }
 0x29e   : > { %p806_p7 = pnand %p809_p6, %p1028_p8 }
 0x2a0   : > { %p807_p9 = pneg %p806_p7 }
 0x2a2   : > { %918 = dma.done.wait (%p807_p9), %s658_s20, 128  }
 0x2a3   : > { %920 = vsyncadd (%p807_p9), %s658_s20, 4294967168  ;;  %s19_s26 = sadd.s32 1, %s943_s26   ;;  %s1199_s21 = smov %s927_s22 }
 0x2a4   : > { %p16_p10 = scmp.ge.s32.totalorder %s19_s26, 4   ;;  %s1200_s22 = smov %s931_s23 }
 0x2a5   : > { %s1201_s23 = smov %s1034_s10  ;;  %s1202_s24 = smov %s939_s25 }
 0x2a6   : > { %s1203_s25 = smov %s1205_s29  ;;  %18 = sbr.rel (!%p16_p10) target bundleno = 4 (0x4), region = 92 }
 0x2ab   :  { %664 = vsyncpa [#allocation4], 1 }
 0x2ac   :  { %666 = vsyncpa [#allocation4 + $0x1], 1 }

</bundles_post_ra>
